<compile_context>
chip_gen: v7x
topology: tpu7x:2x2x1
jax: 0.10.0
libtpu: 0.0.40
codegen_flags: <defaults>
</compile_context>

<pallas_src>
import functools
import math

import jax
import jax.numpy as jnp
from jax.experimental import pallas as pl
from jax.experimental.pallas import tpu as pltpu

_MIB = 1024 * 1024


# ----------------------------------------------------------------------------
# Generation-aware VMEM budgets (block budgets are for a SINGLE block; the
# planners below already assume 2x input / 2x output double buffering).
# ----------------------------------------------------------------------------
def _vmem_caps():
    cap = 64 * _MIB                         # conservative default (v7x per-TC)
    try:
        info = pltpu.get_tpu_info()
        c = getattr(info, "vmem_capacity_bytes", None)
        if c:
            cap = int(c)
    except Exception:
        pass
    vmem_limit = min((cap * 3) // 4, 112 * _MIB)   # ~96 MiB v5e/v6e, ~48 MiB v7x
    call_budget = min(cap // 2, 64 * _MIB)
    return dict(
        vmem_limit=int(vmem_limit),
        pool_block=int(min(call_budget // 2, 16 * _MIB)),  # 2x(input) + tiny out
        add_block=int(min(call_budget // 4, 16 * _MIB)),   # 2x(in) + 2x(out)
    )


def _round_up(v, m):
    return ((v + m - 1) // m) * m


def _r8(v):
    return max(8, _round_up(v, 8))


# ----------------------------------------------------------------------------
# Kernel 1: global average pool  (B, C, S) -> (B, C, 1)  f32.
# ----------------------------------------------------------------------------
def _pool_full_kernel(x_ref, out_ref, *, inv_s):
    # Whole S range in one block: no reduction axis, no mask, no scratch.
    x = x_ref[...].astype(jnp.float32)                        # (B, c_tile, S)
    out_ref[...] = jnp.sum(x, axis=-1, keepdims=True) * inv_s


def _pool_tiled_kernel(x_ref, out_ref, *, s_total, s_tile, need_mask):
    si = pl.program_id(1)
    n_s = pl.num_programs(1)

    @pl.when(si == 0)
    def _():
        out_ref[...] = jnp.zeros_like(out_ref)

    x = x_ref[...].astype(jnp.float32)                        # (B, c_tile, s_tile)

    if need_mask:
        # Only the last S block can over-read; gate the mask there.
        @pl.when(si < n_s - 1)
        def _():
            out_ref[...] += jnp.sum(x, axis=-1, keepdims=True)

        @pl.when(si == n_s - 1)
        def _():
            pos = si * s_tile + jax.lax.broadcasted_iota(jnp.int32, x.shape, 2)
            xm = jnp.where(pos < s_total, x, 0.0)
            out_ref[...] += jnp.sum(xm, axis=-1, keepdims=True)
    else:
        out_ref[...] += jnp.sum(x, axis=-1, keepdims=True)

    @pl.when(si == n_s - 1)
    def _():
        out_ref[...] *= (1.0 / s_total)


def _plan_pool(B, C, S, itemsize, block_budget):
    row = B * S * itemsize                                    # one channel, full S
    # --- full-S path: each (b, c) row is one contiguous DMA run -------------
    if C <= 8:
        if row * C <= block_budget:
            return dict(full_s=True, c_tile=C)
    else:
        max_c = block_budget // max(1, row)
        if max_c >= 8:
            c_tile = min(C, (int(max_c) // 8) * 8)
            if c_tile >= C and C >= 16:
                # >=2 C blocks so both v7x TensorCores get work.
                c_tile = min(C, _r8(pl.cdiv(C, 2)))
            return dict(full_s=True, c_tile=c_tile)
    # --- tiled-S path (very large S) ----------------------------------------
    c_tile = C if C <= 8 else min(128, _r8(pl.cdiv(C, 2)))
    max_s = block_budget // max(1, B * c_tile * itemsize)
    s_tile = max(128, (int(max_s) // 128) * 128)
    s_tile = min(s_tile, _round_up(S, 128))
    return dict(full_s=False, c_tile=c_tile, s_tile=s_tile)


def _global_avg_pool(x_flat, caps):
    """x_flat: (B, C, S) any float dtype -> (B, C, 1) float32 mean over S."""
    B, C, S = x_flat.shape
    plan = _plan_pool(B, C, S, x_flat.dtype.itemsize, caps["pool_block"])
    c_tile = plan["c_tile"]
    n_c = pl.cdiv(C, c_tile)
    cost = pl.CostEstimate(
        flops=B * C * S, transcendentals=0,
        bytes_accessed=B * C * S * x_flat.dtype.itemsize + B * C * 4)

    if plan["full_s"]:
        return pl.pallas_call(
            functools.partial(_pool_full_kernel, inv_s=1.0 / S),
            out_shape=jax.ShapeDtypeStruct((B, C, 1), jnp.float32),
            grid=(n_c,),
            in_specs=[pl.BlockSpec((B, c_tile, S), lambda ci: (0, ci, 0))],
            out_specs=pl.BlockSpec((B, c_tile, 1), lambda ci: (0, ci, 0)),
            compiler_params=pltpu.CompilerParams(
                dimension_semantics=("parallel",),
                vmem_limit_bytes=caps["vmem_limit"]),
            cost_estimate=cost,
        )(x_flat)

    s_tile = plan["s_tile"]
    n_s = pl.cdiv(S, s_tile)
    need_mask = (S % s_tile) != 0
    kernel = functools.partial(_pool_tiled_kernel, s_total=S, s_tile=s_tile,
                               need_mask=need_mask)
    return pl.pallas_call(
        kernel,
        out_shape=jax.ShapeDtypeStruct((B, C, 1), jnp.float32),
        grid=(n_c, n_s),
        in_specs=[pl.BlockSpec((B, c_tile, s_tile), lambda ci, si: (0, ci, si))],
        out_specs=pl.BlockSpec((B, c_tile, 1), lambda ci, si: (0, ci, 0)),
        compiler_params=pltpu.CompilerParams(
            dimension_semantics=("parallel", "arbitrary"),
            vmem_limit_bytes=caps["vmem_limit"]),
        cost_estimate=cost,
    )(x_flat)


# ----------------------------------------------------------------------------
# Kernel 2: attention fusion head on the pooled (B, C) slabs.
# ----------------------------------------------------------------------------
def _attn_head_kernel(i3d_p_ref, shuf_p_ref,
                      wq_ref, bq_ref, wk_ref, bk_ref, wv_ref, bv_ref,
                      wfc_top_ref, wfc_bot_ref, bfc_ref, out_ref):
    i3d_p = i3d_p_ref[...]                                    # (B, Ci) f32
    shuf_p = shuf_p_ref[...]                                  # (B, Cs) f32

    q = jnp.dot(i3d_p, wq_ref[...], preferred_element_type=jnp.float32) + bq_ref[...]
    k = jnp.dot(shuf_p, wk_ref[...], preferred_element_type=jnp.float32) + bk_ref[...]
    v = jnp.dot(shuf_p, wv_ref[...], preferred_element_type=jnp.float32) + bv_ref[...]

    # scores = Q @ K^T / sqrt(d) contracting the last dims (no XLU transpose).
    scale = 1.0 / math.sqrt(q.shape[-1])
    scores = jax.lax.dot_general(
        q, k, (((1,), (1,)), ((), ())),
        preferred_element_type=jnp.float32) * scale           # (B, B)

    # softmax(dim=-1), numerically stable; EUP reciprocal + one Newton step
    # keeps full f32 accuracy while avoiding the VPU divide path.
    m = jnp.max(scores, axis=-1, keepdims=True)
    e = jnp.exp(scores - m)
    denom = jnp.sum(e, axis=-1, keepdims=True)
    r = pl.reciprocal(denom, approx=True)
    r = r * (2.0 - denom * r)
    attn = e * r

    attn_out = jnp.dot(attn, v, preferred_element_type=jnp.float32)  # (B, Ci)

    # cat((i3d_p, attn_out)) @ wfc == i3d_p @ wfc_top + attn_out @ wfc_bot
    fused = (jnp.dot(i3d_p, wfc_top_ref[...], preferred_element_type=jnp.float32)
             + jnp.dot(attn_out, wfc_bot_ref[...], preferred_element_type=jnp.float32)
             + bfc_ref[...])
    out_ref[...] = jnp.maximum(fused, 0.0)                    # ReLU


def _attention_head(i3d_pooled, shuf_pooled, params, caps):
    B, Ci = i3d_pooled.shape
    # TODO(synk): for very large channel counts the un-tiled head weights may
    # not fit the per-core VMEM limit; tile the QKV/fc matmuls over
    # output-channel blocks in that case.
    return pl.pallas_call(
        _attn_head_kernel,
        out_shape=jax.ShapeDtypeStruct((B, Ci), jnp.float32),
        compiler_params=pltpu.CompilerParams(
            vmem_limit_bytes=caps["vmem_limit"]),
    )(i3d_pooled, shuf_pooled,
      params["wq"], params["bq"], params["wk"], params["bk"],
      params["wv"], params["bv"],
      params["wfc_top"], params["wfc_bot"], params["bfc"])


# ----------------------------------------------------------------------------
# Kernel 3: streaming broadcast-add.  fused rides as a (B, c_tile, 1) block
# indexed only by the C tile (DMA'd once per C tile, never per grid step).
# ----------------------------------------------------------------------------
def _broadcast_add_kernel(feat_ref, fused_ref, out_ref):
    out_ref[...] = (feat_ref[...].astype(jnp.float32)
                    + fused_ref[...]).astype(out_ref.dtype)


def _plan_add(B, C, S, itemsize, block_budget):
    s_target = min(S, 512)
    if B * C * itemsize * s_target <= block_budget:
        c_tile = C                               # fused block loads exactly once
    else:
        c_tile = C if C <= 8 else min(256, _r8(pl.cdiv(C, 2)))
        while c_tile > 8 and B * c_tile * itemsize * s_target > block_budget:
            c_tile = _r8(c_tile // 2)
    if S <= 128:
        s_tile = S
    else:
        max_s = block_budget // max(1, B * c_tile * itemsize)
        s_tile = max(128, (min(int(max_s), _round_up(S, 128)) // 128) * 128)
        if s_tile >= S:
            s_tile = S
    # megacore: with a single C block, make sure there are >=2 S blocks.
    if pl.cdiv(C, c_tile) == 1 and s_tile == S and S > 128:
        s_tile = max(128, _round_up(pl.cdiv(S, 2), 128))
    return c_tile, s_tile


def _broadcast_add(feat_flat, fused_col, caps):
    B, C, S = feat_flat.shape
    itemsize = feat_flat.dtype.itemsize
    c_tile, s_tile = _plan_add(B, C, S, itemsize, caps["add_block"])
    n_c = pl.cdiv(C, c_tile)
    n_s = pl.cdiv(S, s_tile)
    cost = pl.CostEstimate(
        flops=B * C * S, transcendentals=0,
        bytes_accessed=2 * B * C * S * itemsize + B * C * 4)
    return pl.pallas_call(
        _broadcast_add_kernel,
        out_shape=jax.ShapeDtypeStruct((B, C, S), feat_flat.dtype),
        grid=(n_c, n_s),
        in_specs=[pl.BlockSpec((B, c_tile, s_tile), lambda ci, si: (0, ci, si)),
                  pl.BlockSpec((B, c_tile, 1), lambda ci, si: (0, ci, 0))],
        out_specs=pl.BlockSpec((B, c_tile, s_tile), lambda ci, si: (0, ci, si)),
        input_output_aliases={0: 0},          # output reuses the i3d buffer
        compiler_params=pltpu.CompilerParams(
            dimension_semantics=("parallel", "parallel"),
            vmem_limit_bytes=caps["vmem_limit"]),
        cost_estimate=cost,
    )(feat_flat, fused_col)


# ----------------------------------------------------------------------------
# Wrapper: full AttentionBasedFusion forward.
# ----------------------------------------------------------------------------
def attention_based_fusion(i3d_feat, shuf_feat, params, *, caps=None):
    if caps is None:
        caps = _vmem_caps()

    B, Ci = i3d_feat.shape[:2]
    Bs, Cs = shuf_feat.shape[:2]
    assert B == Bs, "batch sizes must match"
    S_i = math.prod(i3d_feat.shape[2:])
    S_s = math.prod(shuf_feat.shape[2:])

    # Big activations stay in their native dtype; all accumulation is f32.
    i3d_flat = i3d_feat.reshape(B, Ci, S_i)
    shuf_flat = shuf_feat.reshape(B, Cs, S_s)

    # --- pass 1: streaming global average pools -----------------------------
    i3d_pooled = _global_avg_pool(i3d_flat, caps)[..., 0]     # (B, Ci) f32
    shuf_pooled = _global_avg_pool(shuf_flat, caps)[..., 0]   # (B, Cs) f32

    # --- pass 2: tiny attention head (fully VMEM resident) ------------------
    fused = _attention_head(i3d_pooled, shuf_pooled, params, caps)  # (B, Ci)

    # --- pass 3: streaming broadcast over T*H*W + residual add --------------
    out_flat = _broadcast_add(i3d_flat, fused.reshape(B, Ci, 1), caps)
    return out_flat.reshape(i3d_feat.shape)


# ----------------------------------------------------------------------------
# Deterministic parameter construction (shapes from nn.Linear in __init__).
# Weights pre-transposed to (in, out); fc weight pre-split (no in-kernel cat).
# ----------------------------------------------------------------------------
def init_params(key, i3d_channels, shufflenet_channels):
    Ci, Cs = i3d_channels, shufflenet_channels
    ks = jax.random.split(key, 8)

    def lin(kw, kb, fan_in, fan_out):
        bound = 1.0 / math.sqrt(fan_in)
        w = jax.random.uniform(kw, (fan_in, fan_out), jnp.float32, -bound, bound)
        b = jax.random.uniform(kb, (1, fan_out), jnp.float32, -bound, bound)
        return w, b

    wq, bq = lin(ks[0], ks[1], Ci, Ci)          # query: Ci -> Ci
    wk, bk = lin(ks[2], ks[3], Cs, Cs)          # key:   Cs -> Cs
    wv, bv = lin(ks[4], ks[5], Cs, Ci)          # value: Cs -> Ci
    wfc, bfc = lin(ks[6], ks[7], Ci + Cs, Ci)   # fc: (Ci+Cs) -> Ci
    return dict(wq=wq, bq=bq, wk=wk, bk=bk, wv=wv, bv=bv,
                wfc_top=wfc[:Ci], wfc_bot=wfc[Ci:], bfc=bfc)


# pure-JAX reference for the correctness check
def reference(i3d_feat, shuf_feat, p):
    i3d_pooled = jnp.mean(i3d_feat.astype(jnp.float32), axis=(2, 3, 4))
    shuf_pooled = jnp.mean(shuf_feat.astype(jnp.float32), axis=(2, 3, 4))
    Q = i3d_pooled @ p["wq"] + p["bq"]
    K = shuf_pooled @ p["wk"] + p["bk"]
    V = shuf_pooled @ p["wv"] + p["bv"]
    scores = (Q @ K.T) / math.sqrt(Q.shape[-1])
    attn = jax.nn.softmax(scores, axis=-1)
    attn_out = attn @ V
    wfc = jnp.concatenate([p["wfc_top"], p["wfc_bot"]], axis=0)
    fused_in = jnp.concatenate([i3d_pooled, attn_out], axis=1)
    fused = jax.nn.relu(fused_in @ wfc + p["bfc"])
    return (fused[:, :, None, None, None] + i3d_feat).astype(i3d_feat.dtype)


if __name__ == "__main__":
    key = jax.random.PRNGKey(0)
    k1, k2, k3, k4, k5 = jax.random.split(key, 5)

    # --- test 1: default generation-aware tiling (full-S pool path) ---------
    B, Ci, Cs = 4, 32, 32          # module requires Ci == Cs for shape consistency
    i3d_feat = jax.random.normal(k1, (B, Ci, 4, 8, 8), jnp.float32)
    shuf_feat = jax.random.normal(k2, (B, Cs, 2, 4, 4), jnp.float32)
    params = init_params(k3, Ci, Cs)

    out = jax.block_until_ready(attention_based_fusion(i3d_feat, shuf_feat, params))
    ref = reference(i3d_feat, shuf_feat, params)
    assert out.shape == i3d_feat.shape
    assert jnp.allclose(out, ref, atol=1e-4, rtol=1e-4)

    # --- test 2: tiny budgets -> tiled/masked pool + partial edge blocks ----
    B2, C2 = 2, 16
    i3d2 = jax.random.normal(k4, (B2, C2, 3, 10, 10), jnp.float32)
    shuf2 = jax.random.normal(k5, (B2, C2, 2, 5, 5), jnp.float32)
    params2 = init_params(k3, C2, C2)
    small_caps = dict(_vmem_caps())
    small_caps["pool_block"] = 8 * 1024
    small_caps["add_block"] = 8 * 1024
    out2 = jax.block_until_ready(
        attention_based_fusion(i3d2, shuf2, params2, caps=small_caps))
    ref2 = reference(i3d2, shuf2, params2)
    assert out2.shape == i3d2.shape
    assert jnp.allclose(out2, ref2, atol=1e-4, rtol=1e-4)

    print("KERNEL_OK")
</pallas_src>

<mosaic_0001>
module attributes {stable_mosaic.version = 11 : i64} {
  func.func @_pool_full_kernel(%arg0: i32, %arg1: memref<4x16x256xf32, #tpu.memory_space<vmem>>, %arg2: memref<4x16x1xf32, #tpu.memory_space<vmem>>) attributes {dimension_semantics = [#tpu.dimension_semantics<parallel>], iteration_bounds = array<i64: 2>, scalar_prefetch = 0 : i64, scratch_operands = 0 : i64, tpu.core_type = #tpu.core_type<tc>, window_params = [{transform_indices = @transform_0, window_bounds = array<i64: 4, 16, 256>}, {transform_indices = @transform_1, window_bounds = array<i64: 4, 16, 1>}]} {
    %c0 = arith.constant 0 : index
    %c0_0 = arith.constant 0 : index
    %c0_1 = arith.constant 0 : index
    %0 = vector.load %arg1[%c0, %c0_0, %c0_1] : memref<4x16x256xf32, #tpu.memory_space<vmem>>, vector<4x16x256xf32>
    %cst = arith.constant dense<0.000000e+00> : vector<4x16xf32>
    %1 = vector.multi_reduction <add>, %0, %cst [2] : vector<4x16x256xf32> to vector<4x16xf32>
    %2 = vector.shape_cast %1 : vector<4x16xf32> to vector<4x16x1xf32>
    %cst_2 = arith.constant 3.906250e-03 : f32
    %3 = vector.broadcast %cst_2 : f32 to vector<4x16x1xf32>
    %4 = arith.mulf %2, %3 : vector<4x16x1xf32>
    %c0_3 = arith.constant 0 : index
    %c0_4 = arith.constant 0 : index
    %c0_5 = arith.constant 0 : index
    %5 = vector.load %arg2[%c0_3, %c0_4, %c0_5] : memref<4x16x1xf32, #tpu.memory_space<vmem>>, vector<4x16x1xf32>
    tpu.vector_store %arg2[%c0_3, %c0_4, %c0_5], %4 {strides = array<i32>} : memref<4x16x1xf32, #tpu.memory_space<vmem>>, vector<4x16x1xf32>,
    return
  }
  func.func @transform_0(%arg0: i32) -> (i32, i32, i32) {
    %c0_i32 = arith.constant 0 : i32
    %c0_i32_0 = arith.constant 0 : i32
    %c0_i32_1 = arith.constant 0 : i32
    return %c0_i32, %arg0, %c0_i32_0 : i32, i32, i32
  }
  func.func @transform_1(%arg0: i32) -> (i32, i32, i32) {
    %c0_i32 = arith.constant 0 : i32
    %c0_i32_0 = arith.constant 0 : i32
    %c0_i32_1 = arith.constant 0 : i32
    return %c0_i32, %arg0, %c0_i32_0 : i32, i32, i32
  }
}

</mosaic_0001>

<bundles_post_ra>
// kernel: tpu_custom_call.1
= control target key start
LH: loop header
LB: loop body
LE: loop exit
PB: predicated region body
PF: predicated region fallthrough
CT: control target
= control target key end

     0   :  { %6 = vsyncpa [#allocation3], 0  ;;  %s594_s0 = inlined_call_operand.hbm [shape: f32[4,32,256], index: 0, kind: input, shape index: {}]   ;;  %s595_s1 = inlined_call_operand.vmem [shape: f32[4,32,1], index: 1, kind: output, shape index: {}]  }
   0x1   :  { %8 = vsyncpa [#allocation3 + $0x1], 0  ;;  %s467_s6 = smov 0   ;;  %s469_s7 = smov 0  }
   0x2   :  { %s471_s8 = smov 0   ;;  %s473_s9 = smov 0  }
   0x3 LB: > { %s486_s10 = sadd.s32 4294967295, %s449_s9   ;;  %s489_s11 = sadd.s32 1, %s449_s9   ;;  %s449_s9 = sphi %s473_s9, %s602_s9   ;;  %s445_s8 = sphi %s471_s8, %s601_s8   ;;  %s441_s7 = sphi %s469_s7, %s600_s7   ;;  %s437_s6 = sphi %s467_s6, %s599_s6  }
   0x4   : > { %s18_s12 = ssub.s32 %s449_s9, %s489_s11  ;;  %s21_s13 = sadd.s32 1, %s445_s8 }
   0x5   : > { %p19_p0 = scmp.eq.s32.totalorder %s18_s12, 0  ;;  %p28_p1 = scmp.ne.s32.totalorder %s445_s8, %s441_s7 }
   0x6   : > { %p29_p2 = scmp.eq.s32.totalorder %s449_s9, 0  ;;  %p34_p3 = scmp.ne.s32.totalorder %s441_s7, %s437_s6 }
   0x7   : > { %s499_s14 = scalar_select %p19_p0, %s445_s8, %s21_s13  }
   0x8   : > { %p501_p4 = por %p29_p2, %p28_p1  ;;  %p35_p5 = scmp.eq.s32.totalorder %s486_s10, 0 }
   0x9   : > { %p58_p6 = scmp.eq.s32.totalorder %s486_s10, 1  ;;  %p350_p9 = scmp.ge.s32.totalorder %s449_s9, 2 }
   0xa   : > { %p507_p7 = por %p35_p5, %p34_p3 }
   0xb   : > { %p511_p8 = por %p58_p6, %p28_p1  ;;  %80 = sbr.rel (%p350_p9) target bundleno = 31 (0x1f), region = 16 }
  0x12   : > { %s84_s18 = sand.u32 1, %s445_s8   ;;  %s366_s19 = sshll.u32 %s449_s9, 9 }
  0x13   : > { %s351_s20 = sshll.u32 %s84_s18, 7  ;;  %s95_s23 = scalar_lea.hbm %s594_s0, %s366_s19 }
  0x14   : > { %s368_s24 = scalar_select %p501_p4, [#allocation0], [#allocation7] }
  0x15   : > { %s88_s25 = scalar_lea.vmem [#allocation2], %s351_s20  ;;  %s451_s28 = smov 1024  }
  0x16   : > { %s108_s26 = sshll.u32 %s88_s25, 4  ;;  %s100_s27 = sld [smem:[%s368_s24]]   ;;  %s109_s26 = int_to_ptr.vmem [resolvable:$true] %s108_s26 }
  0x17   : > { %369 = sst [smem:[#allocation6]] (%p501_p4), %s451_s28  ;;  %s452_s29 = smov 512  }
  0x18   : > { %370 = sst [smem:[#allocation6 + $0x1]] (%p501_p4), %s452_s29  ;;  %s453_s30 = smov 2  }
  0x19   : > { %371 = sst [smem:[#allocation6 + $0x2]] (%p501_p4), %s453_s30  ;;  %s454_s2 = smov 256  }
  0x1a   : > { %372 = sst [smem:[#allocation6 + $0x3]] (%p501_p4), %s454_s2  ;;  %s455_s4 = smov 16  }
  0x1b   : > { %373 = sst [smem:[#allocation6 + $0x4]] (%p501_p4), %s454_s2  ;;  %s85_s6 = scalar_lea.sflag [#allocation3], %s84_s18 }
  0x1c   : > { %s355_s3 = sshll.u32 %s100_s27, 26  ;;  %374 = sst [smem:[#allocation6 + $0x5]] (%p501_p4), %s455_s4 }
  0x1d   : > { %s356_s5 = sadd.s32 134217728, %s355_s3  ;;  %s456_s12 = smov [#allocation5]  }
  0x1e   : > { %375 = dma.general (%p501_p4), %s95_s23, 2048, %s109_s26, %s85_s6, %s456_s12, [#allocation6], %s356_s5, 0  }
  0x1f PF: > { %p357_p10 = scmp.ge.s32.totalorder %s449_s9, 1  ;;  %p129_p11 = scmp.lt.s32.totalorder %s449_s9, 3 }
  0x21   : > { %p130_p12 = pnand %p357_p10, %p129_p11 }
  0x22   : > { %s540_s13 = sand.u32 (!%p130_p12), 1, %s441_s7  }
  0x23   : > { %133 = sbr.rel (%p130_p12) target bundleno = 212 (0xd4), region = 24  ;;  %s358_s19 = sshll.u32 (!%p130_p12), %s540_s13, 7 }
  0x24   : > { %s136_s20 = scalar_lea.sflag (!%p130_p12), [#allocation3], %s540_s13  ;;  %s139_s21 = scalar_lea.vmem (!%p130_p12), [#allocation2], %s358_s19 }
  0x2a   : > { %432 = dma.done.wait (%p507_p7), %s136_s20, 2048  }
  0x2b   : > { %434 = vsyncadd (%p507_p7), %s136_s20, 4294965248  ;;  %v163_v0 = vld [vmem:[%s139_s21 + $0x20] sm:$0xff]  ;;  %v164_v1 = vld [vmem:[%s139_s21 + $0x28] sm:$0xff]  ;;  %s359_s9 = sshll.u32 %s540_s13, 6  ;;  %vm207_vm0 = vcmask 7168   ;;  %s367_s16 = sshll.u32 (%p511_p8), %s486_s10, 4 }
  0x2c   : > { %v159_v2 = vld [vmem:[%s139_s21] sm:$0xff]  ;;  %v181_v3 = vadd.f32 %v164_v1, %v163_v0  ;;  %v160_v4 = vld [vmem:[%s139_s21 + $0x8] sm:$0xff]  ;;  %v165_v5 = vld [vmem:[%s139_s21 + $0x30] sm:$0xff]  ;;  %s549_s15 = scalar_lea.vmem [#allocation4], %s359_s9  ;;  %s225_s23 = scalar_lea.vmem (%p511_p8), %s595_s1, %s367_s16 }
  0x2d   : > { %v166_v6 = vld [vmem:[%s139_s21 + $0x38] sm:$0xff]  ;;  %v175_v7 = vadd.f32 %v160_v4, %v159_v2  ;;  %v161_v8 = vld [vmem:[%s139_s21 + $0x10] sm:$0xff]  ;;  %v167_v14 = vld [vmem:[%s139_s21 + $0x40] sm:$0xff] }
  0x2e   : > { %v162_v9 = vld [vmem:[%s139_s21 + $0x18] sm:$0xff]  ;;  %182 = vadd.xlane.f32.xlu1 %v181_v3  ;;  %v184_v10 = vadd.f32 %v166_v6, %v165_v5  ;;  %v169_v12 = vld [vmem:[%s139_s21 + $0x50] sm:$0xff]  ;;  %v168_v15 = vld [vmem:[%s139_s21 + $0x48] sm:$0xff] }
  0x2f   : > { %176 = vadd.xlane.f32.xlu0 %v175_v7  ;;  %v178_v11 = vadd.f32 %v162_v9, %v161_v8  ;;  %v170_v13 = vld [vmem:[%s139_s21 + $0x58] sm:$0xff]  ;;  %v187_v17 = vadd.f32 %v168_v15, %v167_v14  ;;  %v173_v18 = vld [vmem:[%s139_s21 + $0x70] sm:$0xff]  ;;  %v171_v20 = vld [vmem:[%s139_s21 + $0x60] sm:$0xff] }
  0x30   : > { %v190_v16 = vadd.f32 %v170_v13, %v169_v12  ;;  %v174_v19 = vld [vmem:[%s139_s21 + $0x78] sm:$0xff]  ;;  %v172_v21 = vld [vmem:[%s139_s21 + $0x68] sm:$0xff] }
  0x31   : > { %v196_v22 = vadd.f32 %v174_v19, %v173_v18  ;;  %v193_v23 = vadd.f32 %v172_v21, %v171_v20 }
  0x32   : > { %185 = vadd.xlane.f32.xlu1 %v184_v10 }
  0x33   : > { %179 = vadd.xlane.f32.xlu0 %v178_v11 }
  0x36   : > { %191 = vadd.xlane.f32.xlu1 %v190_v16 }
  0x37   : > { %188 = vadd.xlane.f32.xlu0 %v187_v17 }
  0x3a   : > { %197 = vadd.xlane.f32.xlu1 %v196_v22 }
  0x3b   : > { %194 = vadd.xlane.f32.xlu0 %v193_v23 }
  0xbb   : > { %v183_v24 = vpop.xlane.xlu1 %182 }
  0xbc   : > { %v201_v25 = vmul.f32 0.00390625, %v183_v24  ;;  %v177_v26 = vpop.xlane.xlu0 %176 }
  0xbd   : > { %v199_v27 = vmul.f32 0.00390625, %v177_v26 }
  0xbe   : > { %210 = vst.msk [vmem:[%s549_s15 + $0x10] sm:$0xff] %vm207_vm0, %v201_v25 }
  0xbf   : > { %208 = vst.msk [vmem:[%s549_s15] sm:$0xff] %vm207_vm0, %v199_v27  ;;  %v186_v28 = vpop.xlane.xlu1 %185 }
  0xc0   : > { %v202_v29 = vmul.f32 0.00390625, %v186_v28  ;;  %v180_v30 = vpop.xlane.xlu0 %179 }
  0xc1   : > { %v200_v31 = vmul.f32 0.00390625, %v180_v30 }
  0xc2   : > { %211 = vst.msk [vmem:[%s549_s15 + $0x18] sm:$0xff] %vm207_vm0, %v202_v29 }
  0xc3   : > { %209 = vst.msk [vmem:[%s549_s15 + $0x8] sm:$0xff] %vm207_vm0, %v200_v31  ;;  %v192_v32 = vpop.xlane.xlu1 %191 }
  0xc4   : > { %v204_v33 = vmul.f32 0.00390625, %v192_v32  ;;  %v189_v34 = vpop.xlane.xlu0 %188 }
  0xc5   : > { %v203_v35 = vmul.f32 0.00390625, %v189_v34  ;;  %222 = sbr.rel (!%p511_p8) target bundleno = 212 (0xd4), region = 32  ;;  %v271_v42 = vld [vmem:[%s549_s15 + $0x10] sm:$0xff] (%p511_p8) }
  0xc6   : > { %213 = vst.msk [vmem:[%s549_s15 + $0x28] sm:$0xff] %vm207_vm0, %v204_v33  ;;  %v267_v40 = vld [vmem:[%s549_s15] sm:$0xff] (%p511_p8)  ;;  %272 = vst [vmem:[%s225_s23 + $0x20] sm:$0xff] (%p511_p8), %v271_v42 }
  0xc7   : > { %212 = vst.msk [vmem:[%s549_s15 + $0x20] sm:$0xff] %vm207_vm0, %v203_v35  ;;  %v198_v36 = vpop.xlane.xlu1 %197  ;;  %268 = vst [vmem:[%s225_s23] sm:$0xff] (%p511_p8), %v267_v40 }
  0xc8   : > { %v206_v37 = vmul.f32 0.00390625, %v198_v36  ;;  %v195_v38 = vpop.xlane.xlu0 %194 }
  0xc9   : > { %v205_v39 = vmul.f32 0.00390625, %v195_v38  ;;  %v273_v43 = vld [vmem:[%s549_s15 + $0x18] sm:$0xff] (%p511_p8) }
  0xca   : > { %215 = vst.msk [vmem:[%s549_s15 + $0x38] sm:$0xff] %vm207_vm0, %v206_v37  ;;  %v269_v41 = vld [vmem:[%s549_s15 + $0x8] sm:$0xff] (%p511_p8)  ;;  %274 = vst [vmem:[%s225_s23 + $0x28] sm:$0xff] (%p511_p8), %v273_v43 }
  0xcb   : > { %214 = vst.msk [vmem:[%s549_s15 + $0x30] sm:$0xff] %vm207_vm0, %v205_v39  ;;  %270 = vst [vmem:[%s225_s23 + $0x8] sm:$0xff] (%p511_p8), %v269_v41 }
  0xcd   : > { %v277_v45 = vld [vmem:[%s549_s15 + $0x28] sm:$0xff] }
  0xce   : > { %v275_v44 = vld [vmem:[%s549_s15 + $0x20] sm:$0xff]  ;;  %278 = vst [vmem:[%s225_s23 + $0x48] sm:$0xff] %v277_v45 }
  0xcf   : > { %276 = vst [vmem:[%s225_s23 + $0x40] sm:$0xff] %v275_v44 }
  0xd1   : > { %v281_v47 = vld [vmem:[%s549_s15 + $0x38] sm:$0xff] }
  0xd2   : > { %v279_v46 = vld [vmem:[%s549_s15 + $0x30] sm:$0xff]  ;;  %282 = vst [vmem:[%s225_s23 + $0x68] sm:$0xff] %v281_v47 }
  0xd3   : > { %280 = vst [vmem:[%s225_s23 + $0x60] sm:$0xff] %v279_v46 }
  0xd4 PF: > { %p11_p13 = scmp.ge.s32.totalorder %s489_s11, 4   ;;  %s599_s6 = smov %s441_s7 }
  0xd5   : > { %s600_s7 = smov %s445_s8  ;;  %s601_s8 = smov %s499_s14 }
  0xd6   : > { %s602_s9 = smov %s489_s11  ;;  %13 = sbr.rel (!%p11_p13) target bundleno = 3 (0x3), region = 107 }
  0xdd   :  { %298 = vsyncpa [#allocation3], 1 }
  0xde   :  { %300 = vsyncpa [#allocation3 + $0x1], 1 }

</bundles_post_ra>
